<compile_context>
chip_gen: v6e
topology: v6e:2x2x1
jax: 0.10.0
libtpu: 0.0.40
codegen_flags: <defaults>
</compile_context>

<pallas_src>
import functools

import jax
import jax.numpy as jnp
from jax.experimental import pallas as pl
from jax.experimental.pallas import tpu as pltpu


def time2vec_kernel(x_ref, w12_ref, b12_ref, weff_ref, beff_ref, out_ref, *, k1):
    x = x_ref[...].astype(jnp.float32)

    # Stage 1: fused fc1|fc2 -> y[:, :k1] linear, y[:, k1:] = sin(.)
    y = jnp.dot(x, w12_ref[...], preferred_element_type=jnp.float32) + b12_ref[...]
    lane = jax.lax.broadcasted_iota(jnp.int32, y.shape, dimension=1)
    y = jnp.where(lane >= k1, jnp.sin(y), y)

    # Stage 2: pre-composed fc3.fc4.fc5 (dropout = identity at inference).
    h = jnp.dot(y, weff_ref[...], preferred_element_type=jnp.float32) + beff_ref[...]

    out_ref[...] = h.astype(out_ref.dtype)


def _choose_tm(n):
    """Row tile: large enough to amortize per-step overhead, multiple of 8."""
    tm = 4096
    if n <= tm:
        return max(8, ((n + 7) // 8) * 8)
    return tm


def time2vec_forward(x, params):
    """x: [N, in_feats] float32. params: dict of (w, b) pairs (w: [in, out])."""
    n, in_feats = x.shape
    w1, b1 = params["fc1"]
    w2, b2 = params["fc2"]
    w3, b3 = params["fc3"]
    w4, b4 = params["fc4"]
    w5, b5 = params["fc5"]

    k1 = w1.shape[1]
    k = k1 + w2.shape[1]

    # Host-side weight fusion / pre-composition (pure JAX, outside the kernel).
    w12 = jnp.concatenate([w1, w2], axis=1)              # (in_feats, k)
    b12 = jnp.concatenate([b1, b2], axis=1)              # (1, k)
    w_eff = w3 @ w4 @ w5                                  # (k, in_feats)
    b_eff = ((b3 @ w4) + b4) @ w5 + b5                    # (1, in_feats)

    tm = _choose_tm(n)
    grid = (pl.cdiv(n, tm),)

    resident = lambda shape: pl.BlockSpec(shape, lambda i: (0, 0))

    cost = pl.CostEstimate(
        flops=2 * n * (in_feats * k + k * in_feats),
        transcendentals=n * (k - k1),
        bytes_accessed=(x.size + n * in_feats + w12.size + b12.size
                        + w_eff.size + b_eff.size) * 4,
    )

    return pl.pallas_call(
        functools.partial(time2vec_kernel, k1=k1),
        out_shape=jax.ShapeDtypeStruct((n, in_feats), x.dtype),
        grid=grid,
        in_specs=[
            pl.BlockSpec((tm, in_feats), lambda i: (i, 0)),   # x (row-tiled)
            resident(w12.shape),
            resident(b12.shape),
            resident(w_eff.shape),
            resident(b_eff.shape),
        ],
        out_specs=pl.BlockSpec((tm, in_feats), lambda i: (i, 0)),
        compiler_params=pltpu.CompilerParams(
            dimension_semantics=("parallel",),
        ),
        cost_estimate=cost,
    )(x, w12, b12, w_eff, b_eff)


def init_params(key, k=32, in_feats=6):
    """Deterministic init mimicking nn.Linear (uniform +/- 1/sqrt(fan_in))."""
    if k % 2 == 0:
        k1 = k2 = k // 2
    else:
        k1, k2 = k // 2, k // 2 + 1

    def linear(key, fan_in, fan_out):
        kw, kb = jax.random.split(key)
        bound = 1.0 / jnp.sqrt(fan_in)
        w = jax.random.uniform(kw, (fan_in, fan_out), jnp.float32, -bound, bound)
        b = jax.random.uniform(kb, (1, fan_out), jnp.float32, -bound, bound)
        return w, b

    keys = jax.random.split(key, 5)
    return {
        "fc1": linear(keys[0], in_feats, k1),
        "fc2": linear(keys[1], in_feats, k2),
        "fc3": linear(keys[2], k, k // 2),
        "fc4": linear(keys[3], k // 2, in_feats),
        "fc5": linear(keys[4], in_feats, in_feats),
    }


def time2vec_reference(x, params):
    """Pure-JAX reference matching the original (unfused) PyTorch forward."""
    w1, b1 = params["fc1"]
    w2, b2 = params["fc2"]
    w3, b3 = params["fc3"]
    w4, b4 = params["fc4"]
    w5, b5 = params["fc5"]
    out1 = x @ w1 + b1
    out2 = jnp.sin(x @ w2 + b2)
    out = jnp.concatenate([out1, out2], axis=1)
    out = out @ w3 + b3
    out = out @ w4 + b4
    out = out @ w5 + b5
    return out


if __name__ == "__main__":
    key = jax.random.PRNGKey(0)
    k_param, k_x = jax.random.split(key)

    K = 32
    IN_FEATS = 6
    BATCH = 8

    params = init_params(k_param, k=K, in_feats=IN_FEATS)
    x = jax.random.normal(k_x, (BATCH, IN_FEATS), dtype=jnp.float32)

    out = time2vec_forward(x, params)
    out = jax.block_until_ready(out)

    ref = time2vec_reference(x, params)
    assert out.shape == (BATCH, IN_FEATS)
    assert jnp.allclose(out, ref, atol=1e-5, rtol=1e-5)

    print("KERNEL_OK")
</pallas_src>

<mosaic_0001>
module attributes {stable_mosaic.version = 11 : i64} {
  func.func @time2vec_kernel(%arg0: i32, %arg1: memref<8x6xf32, #tpu.memory_space<vmem>>, %arg2: memref<6x32xf32, #tpu.memory_space<vmem>>, %arg3: memref<1x32xf32, #tpu.memory_space<vmem>>, %arg4: memref<32x6xf32, #tpu.memory_space<vmem>>, %arg5: memref<1x6xf32, #tpu.memory_space<vmem>>, %arg6: memref<8x6xf32, #tpu.memory_space<vmem>>) attributes {dimension_semantics = [#tpu.dimension_semantics<parallel>], iteration_bounds = array<i64: 1>, scalar_prefetch = 0 : i64, scratch_operands = 0 : i64, tpu.core_type = #tpu.core_type<tc>, window_params = [{transform_indices = @transform_0, window_bounds = array<i64: 8, 6>}, {pipeline_mode = #tpu.pipeline_mode<synchronous>, transform_indices = @transform_1, window_bounds = array<i64: 6, 32>}, {pipeline_mode = #tpu.pipeline_mode<synchronous>, transform_indices = @transform_2, window_bounds = array<i64: 1, 32>}, {pipeline_mode = #tpu.pipeline_mode<synchronous>, transform_indices = @transform_3, window_bounds = array<i64: 32, 6>}, {pipeline_mode = #tpu.pipeline_mode<synchronous>, transform_indices = @transform_4, window_bounds = array<i64: 1, 6>}, {transform_indices = @transform_5, window_bounds = array<i64: 8, 6>}]} {
    %c0 = arith.constant 0 : index
    %c0_0 = arith.constant 0 : index
    %0 = vector.load %arg1[%c0, %c0_0] : memref<8x6xf32, #tpu.memory_space<vmem>>, vector<8x6xf32>
    %c0_1 = arith.constant 0 : index
    %c0_2 = arith.constant 0 : index
    %1 = vector.load %arg2[%c0_1, %c0_2] : memref<6x32xf32, #tpu.memory_space<vmem>>, vector<6x32xf32>
    %cst = arith.constant dense<0.000000e+00> : vector<8x32xf32>
    %2 = tpu.matmul %0, %1, %cst {dimension_numbers = #tpu.dot_dimension_numbers<[1], [0], [0], [1], [0, 0, 1, 1], [], []>} : vector<8x6xf32>, vector<6x32xf32>, vector<8x32xf32> -> vector<8x32xf32>
    %c0_3 = arith.constant 0 : index
    %c0_4 = arith.constant 0 : index
    %3 = vector.load %arg3[%c0_3, %c0_4] : memref<1x32xf32, #tpu.memory_space<vmem>>, vector<1x32xf32>
    %4 = vector.broadcast %3 : vector<1x32xf32> to vector<8x32xf32>
    %5 = arith.addf %2, %4 : vector<8x32xf32>
    %6 = tpu.iota {dimensions = array<i32: 1>} : vector<8x32xi32>
    %c16_i32 = arith.constant 16 : i32
    %7 = vector.broadcast %c16_i32 : i32 to vector<8x32xi32>
    %8 = arith.cmpi sge, %6, %7 : vector<8x32xi32>
    %9 = math.sin %5 : vector<8x32xf32>
    %10 = arith.select %8, %9, %5 : vector<8x32xi1>, vector<8x32xf32>
    %c0_5 = arith.constant 0 : index
    %c0_6 = arith.constant 0 : index
    %11 = vector.load %arg4[%c0_5, %c0_6] : memref<32x6xf32, #tpu.memory_space<vmem>>, vector<32x6xf32>
    %cst_7 = arith.constant dense<0.000000e+00> : vector<8x6xf32>
    %12 = tpu.matmul %10, %11, %cst_7 {dimension_numbers = #tpu.dot_dimension_numbers<[1], [0], [0], [1], [0, 0, 1, 1], [], []>} : vector<8x32xf32>, vector<32x6xf32>, vector<8x6xf32> -> vector<8x6xf32>
    %c0_8 = arith.constant 0 : index
    %c0_9 = arith.constant 0 : index
    %13 = vector.load %arg5[%c0_8, %c0_9] : memref<1x6xf32, #tpu.memory_space<vmem>>, vector<1x6xf32>
    %14 = vector.broadcast %13 : vector<1x6xf32> to vector<8x6xf32>
    %15 = arith.addf %12, %14 : vector<8x6xf32>
    %c0_10 = arith.constant 0 : index
    %c0_11 = arith.constant 0 : index
    %16 = vector.load %arg6[%c0_10, %c0_11] : memref<8x6xf32, #tpu.memory_space<vmem>>, vector<8x6xf32>
    tpu.vector_store %arg6[%c0_10, %c0_11], %15 {strides = array<i32>} : memref<8x6xf32, #tpu.memory_space<vmem>>, vector<8x6xf32>,
    return
  }
  func.func @transform_0(%arg0: i32) -> (i32, i32) {
    %c0_i32 = arith.constant 0 : i32
    %c0_i32_0 = arith.constant 0 : i32
    return %arg0, %c0_i32 : i32, i32
  }
  func.func @transform_1(%arg0: i32) -> (i32, i32) {
    %c0_i32 = arith.constant 0 : i32
    %c0_i32_0 = arith.constant 0 : i32
    %c0_i32_1 = arith.constant 0 : i32
    return %c0_i32, %c0_i32_0 : i32, i32
  }
  func.func @transform_2(%arg0: i32) -> (i32, i32) {
    %c0_i32 = arith.constant 0 : i32
    %c0_i32_0 = arith.constant 0 : i32
    %c0_i32_1 = arith.constant 0 : i32
    return %c0_i32, %c0_i32_0 : i32, i32
  }
  func.func @transform_3(%arg0: i32) -> (i32, i32) {
    %c0_i32 = arith.constant 0 : i32
    %c0_i32_0 = arith.constant 0 : i32
    %c0_i32_1 = arith.constant 0 : i32
    return %c0_i32, %c0_i32_0 : i32, i32
  }
  func.func @transform_4(%arg0: i32) -> (i32, i32) {
    %c0_i32 = arith.constant 0 : i32
    %c0_i32_0 = arith.constant 0 : i32
    %c0_i32_1 = arith.constant 0 : i32
    return %c0_i32, %c0_i32_0 : i32, i32
  }
  func.func @transform_5(%arg0: i32) -> (i32, i32) {
    %c0_i32 = arith.constant 0 : i32
    %c0_i32_0 = arith.constant 0 : i32
    return %arg0, %c0_i32 : i32, i32
  }
}

</mosaic_0001>

<bundles_post_ra>
// kernel: tpu_custom_call.1
= control target key start
LH: loop header
LB: loop body
LE: loop exit
PB: predicated region body
PF: predicated region fallthrough
CT: control target
= control target key end

     0   :  { %vm34_vm0 = vcmask 1045504   ;;  %v387_v2 = vmov 0.0   ;;  %vm388_vm1 = vmmov 0   ;;  %vm30_vm2 = vcmask 48128   ;;  %s477_s0 = inlined_call_operand.vmem [shape: f32[8,6], index: 0, kind: input, shape index: {}]   ;;  %s478_s1 = inlined_call_operand.vmem [shape: f32[6,32], index: 1, kind: input, shape index: {}]   ;;  %s479_s2 = inlined_call_operand.vmem [shape: f32[1,32], index: 2, kind: input, shape index: {}]   ;;  %s480_s3 = inlined_call_operand.vmem [shape: f32[32,6], index: 3, kind: input, shape index: {}]   ;;  %s481_s4 = inlined_call_operand.vmem [shape: f32[1,6], index: 4, kind: input, shape index: {}]   ;;  %s482_s5 = inlined_call_operand.hbm [shape: f32[8,6], index: 5, kind: output, shape index: {}]  }
   0x1   :  { %v22_v0 = vld [vmem:[%s478_s1] sm:$0x3f]  ;;  %332 = vmatprep.subr.mxu0 %v387_v2  ;;  %334 = vmatprep.mubr.msk.f32.mxu0 %vm388_vm1, %v387_v2 }
   0x2   :  { %v21_v1 = vld [vmem:[%s477_s0] sm:$0xff] }
   0x3   :  { %10 = vsyncpa [#allocation3], 0  ;;  %333 = vmatpush3.msk.msra.mxu0 %vm34_vm0, %v22_v0  ;;  %337 = vmatprep.subr.mxu1 %v387_v2  ;;  %v219_v3 = vld [vmem:[%s480_s3 + $0x18] sm:$0xff]  ;;  %v218_v4 = vld [vmem:[%s480_s3 + $0x10] sm:$0xff]  ;;  %v389_v22 = vmov 2102212464  }
   0x4   :  { %335 = vmatmul.mubr.msk.f32.vlgmr.msra.gmra.mxu0 %vm30_vm2, %v21_v1  ;;  %345 = vmatprep.mubr.msk.f32.mxu1 %vm388_vm1, %v387_v2  ;;  %v217_v5 = vld [vmem:[%s480_s3 + $0x8] sm:$0xff]  ;;  %v216_v6 = vld [vmem:[%s480_s3] sm:$0xff]  ;;  %v390_v24 = vmov 920167782   ;;  %v391_v28 = vmov 1326507024  }
   0x5   :  { %338 = vmatpush3.msra.mxu1 %v219_v3  ;;  %v316_v7 = vld [vmem:[%s479_s2] ss:$0 sm:$0xff]  ;;  %v392_v30 = vmov 683565275   ;;  %v393_v32 = vmov 2475754826  }
   0x6   :  { %339 = vmatprep.subr.mxu1 %v387_v2  ;;  %v394_v35 = vmov 2131351028   ;;  %vm227_vm1 = vcmask 261120   ;;  %s395_s30 = smov [#allocation2]  }
   0x7   :  { %340 = vmatpush3.msra.mxu1 %v218_v4  ;;  %s308_s6 = sshll.u32 %s395_s30, 4  ;;  %s309_s6 = int_to_ptr.vmem [resolvable:$true] %s308_s6 }
   0x8   :  { %341 = vmatprep.subr.mxu1 %v387_v2  ;;  %s365_s7 = scalar_lea.vmem %s309_s6, 128  ;;  %p370_p1 = scmp.lt.s32.totalorder %s309_s6, %s309_s6 }
   0x9   :  { %342 = vmatpush3.msra.mxu1 %v217_v5  ;;  %p366_p0 = scmp.ne.s32.totalorder %s309_s6, %s365_s7  ;;  %p371_p2 = scmp.lt.s32.totalorder %s365_s7, %s365_s7 }
   0xa   :  { %343 = vmatprep.subr.mxu1 %v387_v2 }
   0xb   :  { %344 = vmatpush3.msra.mxu1 %v216_v6  ;;  %p372_p3 = por %p371_p2, %p370_p1 }
   0xd   :  { %p373_p4 = pnand %p372_p3, %p366_p0 }
  0xc4   :  { %v104_v8 = vpop.f32.mrf.mxu0 }
  0xc5   :  { %v448_v9 = vadd.f32 %v316_v7, %v104_v8 }
  0xc6   :  { %v336_v10 = vpop.f32.mrf.mxu0 }
  0xc7   :  { %v114_v11 = vand.u32 2139095040, %v448_v9  ;;  %v111_v12 = vand.u32 2147483647, %v448_v9  ;;  %vm113_vm10 = vcmp.lt.s32.totalorder %v448_v9, 0  ;;  %vm203_vm0 = vweird.f32 %v448_v9 }
  0xc9   :  { %v115_v13 = vshrl.u32 %v114_v11, 23  ;;  %v118_v15 = vand.u32 8388607, %v111_v12  ;;  %vm112_vm11 = vcmp.le.f32.partialorder %v111_v12, 0.7853982 }
  0xcb   :  { %v319_v14 = vadd.s32 4294967169, %v115_v13  ;;  %v119_v18 = vor.u32 8388608, %v118_v15 }
  0xcd   :  { %v121_v16 = vadd.s32 1, %v319_v14  ;;  %v159_v26 = vshll.u32 %v119_v18, 8 }
  0xcf   :  { %vm122_vm3 = vcmp.gt.s32.totalorder %v121_v16, 0 }
  0xd0   :  { %v123_v17 = vsel %vm122_vm3, %v121_v16, 0 }
  0xd1   :  { %v125_v19 = vand.u32 31, %v123_v17  ;;  %v124_v20 = vshrl.u32 %v123_v17, 5 }
  0xd3   :  { %v126_v21 = vsub.s32 32, %v125_v19  ;;  %v137_v23 = vshll.u32 %v389_v22, %v125_v19  ;;  %v140_v25 = vshll.u32 %v390_v24, %v125_v19  ;;  %v128_v31 = vshll.u32 %v392_v30, %v125_v19 }
  0xd4   :  { %v131_v34 = vshll.u32 %v393_v32, %v125_v19  ;;  %v134_v37 = vshll.u32 %v394_v35, %v125_v19  ;;  %vm146_vm4 = vcmp.lt.s32.totalorder %v124_v20, 4  ;;  %vm143_vm5 = vcmp.lt.s32.totalorder %v124_v20, 1 }
  0xd5   :  { %v138_v27 = vshrl.u32 %v390_v24, %v126_v21  ;;  %v141_v29 = vshrl.u32 %v391_v28, %v126_v21  ;;  %v129_v33 = vshrl.u32 %v393_v32, %v126_v21  ;;  %v132_v36 = vshrl.u32 %v394_v35, %v126_v21 }
  0xd6   :  { %v135_v38 = vshrl.u32 %v389_v22, %v126_v21  ;;  %v127_v42 = vshrl.u32 %v392_v30, %v126_v21  ;;  %vm144_vm6 = vcmp.lt.s32.totalorder %v124_v20, 2  ;;  %vm145_vm7 = vcmp.lt.s32.totalorder %v124_v20, 3 }
  0xd7   :  { %v139_v39 = vor.u32 %v138_v27, %v137_v23  ;;  %v142_v40 = vor.u32 %v141_v29, %v140_v25  ;;  %v130_v41 = vor.u32 %v129_v33, %v128_v31  ;;  %v133_v43 = vor.u32 %v132_v36, %v131_v34 }
  0xd8   :  { %v136_v44 = vor.u32 %v135_v38, %v134_v37  ;;  %v108_v31 = vlaneseq }
  0xd9   :  { %v152_v45 = vsel %vm146_vm4, %v139_v39, 920167782  ;;  %v156_v46 = vsel %vm146_vm4, %v142_v40, 1326507024  ;;  %v151_v48 = vsel %vm143_vm5, %v130_v41, %v133_v43  ;;  %v147_v51 = vsel %vm143_vm5, %v127_v42, %v130_v41  ;;  %v323_v42 = vld [vmem:[%s481_s4] ss:$0 sm:$0xff] }
  0xda   :  { %v148_v47 = vsel %vm146_vm4, %v136_v44, 2102212464  ;;  %v153_v49 = vsel %vm145_vm7, %v136_v44, %v152_v45  ;;  %v155_v50 = vsel %vm143_vm5, %v133_v43, %v136_v44  ;;  %v157_v54 = vsel %vm145_vm7, %v139_v39, %v156_v46 }
  0xdb   :  { %v149_v52 = vsel %vm145_vm7, %v133_v43, %v148_v47  ;;  %v154_v53 = vsel %vm144_vm6, %v151_v48, %v153_v49  ;;  %v158_v55 = vsel %vm144_vm6, %v155_v50, %v157_v54  ;;  %v109_v34 = vand.u32 127, %v108_v31 }
  0xdc   :  { %v454_v56 = vmul.u32.u64.low %v159_v26, %v154_v53  ;;  %v455_v57 = vmul.u32.u64.high %v159_v26, %v154_v53, %v454_v56  ;;  %v457_v58 = vmul.u32.u64.low %v159_v26, %v158_v55  ;;  %v458_v59 = vmul.u32.u64.high %v159_v26, %v158_v55, %v457_v58 }
  0xdd   :  { %v150_v60 = vsel %vm144_vm6, %v147_v51, %v149_v52  ;;  %vm110_vm14 = vcmp.ge.s32.totalorder %v109_v34, 16 }
  0xde   :  { %v169_v61 = vadd.s32 1, %v455_v57  ;;  %v166_v62 = vmul.u32 %v159_v26, %v150_v60  ;;  %vm168_vm8 = vc.u32 %v458_v59, %v454_v56  ;;  %v167_v11 = vadd.s32 %v454_v56, %v458_v59 }
  0xe0   :  { %v170_v63 = vsel %vm168_vm8, %v169_v61, %v455_v57 }
  0xe1   :  { %v171_v0 = vadd.s32 %v170_v63, %v166_v62 }
  0xe3   :  { %v172_v1 = vadd.s32 536870912, %v171_v0 }
  0xe5   :  { %v173_v2 = vshrl.u32 %v172_v1, 30 }
  0xe7   :  { %v174_v3 = vshll.u32 %v173_v2, 30  ;;  %v197_v25 = vsub.s32 4, %v173_v2 }
  0xe9   :  { %v175_v4 = vsub.s32 %v171_v0, %v174_v3  ;;  %v198_v28 = vsel %vm113_vm10, %v197_v25, %v173_v2 }
  0xea   :  { %v200_v29 = vsel %vm112_vm11, 0, %v198_v28 }
  0xeb   :  { %v177_v5 = vsub.s32 0, %v175_v4  ;;  %v204_v30 = vadd.s32 3, %v200_v29 }
  0xed   :  { %v320_v6 = vmin.u32 %v177_v5, %v175_v4  ;;  %v205_v32 = vand.u32 3, %v204_v30 }
  0xef   :  { %v179_v7 = vclz %v320_v6  ;;  %vm210_vm12 = vcmp.eq.s32.totalorder %v205_v32, 2  ;;  %vm207_vm13 = vcmp.eq.s32.totalorder %v205_v32, 0  ;;  %vm206_vm15 = vcmp.lt.s32.totalorder %v205_v32, 2 }
  0xf1   :  { %v321_v8 = vadd.s32 4294967294, %v179_v7 }
  0xf3   :  { %vm322_vm9 = vcmp.lt.s32.totalorder %v321_v8, 0 }
  0xf4   :  { %v182_v10 = vsel %vm322_vm9, 0, %v321_v8 }
  0xf5   :  { %v183_v13 = vsub.s32 32, %v182_v10  ;;  %v187_v14 = vsub.s32 4294967266, %v182_v10  ;;  %v184_v15 = vshll.u32 %v175_v4, %v182_v10 }
  0xf7   :  { %v185_v16 = vshrl.u32 %v167_v11, %v183_v13  ;;  %v188_v17 = vadd.s32 127, %v187_v14 }
  0xf9   :  { %v186_v18 = vor.u32 %v185_v16, %v184_v15  ;;  %v189_v19 = vshll.u32 %v188_v17, 23 }
  0xfb   :  { %v190_v20 = vor.u32 4788187, %v189_v19  ;;  %v193_v22 = vcvt.s32.f32 %v186_v18 }
  0xfd   :  { %v191_v21 = vand.u32 2147483647, %v190_v20 }
  0xff   :  { %v194_v23 = vmul.f32 %v193_v22, %v191_v21 }
 0x101   :  { %v195_v24 = vxor.u32 2147483648, %v194_v23 }
 0x103   :  { %v196_v26 = vsel %vm113_vm10, %v195_v24, %v194_v23 }
 0x104   :  { %v199_v27 = vsel %vm112_vm11, %v448_v9, %v196_v26 }
 0x105   :  { %361 = vcosq.f32 %v199_v27 }
 0x106   :  { %363 = vsinq.f32 %v199_v27 }
 0x112   :  { %v362_v33 = vpop.eup %361 }
 0x113   :  { %v364_v35 = vpop.eup %363  ;;  %v211_v36 = vxor.u32 2147483648, %v362_v33 }
 0x114   :  { %v208_v37 = vxor.u32 2147483648, %v364_v35 }
 0x115   :  { %v212_v38 = vsel %vm210_vm12, %v211_v36, %v364_v35 }
 0x116   :  { %v209_v12 = vsel %vm207_vm13, %v362_v33, %v208_v37 }
 0x117   :  { %v213_v39 = vsel %vm206_vm15, %v209_v12, %v212_v38 }
 0x118   :  { %v214_v40 = vsel %vm203_vm0, nan, %v213_v39 }
 0x119   :  { %v215_v41 = vsel %vm110_vm14, %v214_v40, %v448_v9 }
 0x11a   :  { %346 = vmatmul.mubr.msk.f32.vlgmr.msra.gmra.mxu1 %vm227_vm1, %v215_v41 }
 0x1da   :  { %v297_v43 = vpop.f32.mrf.mxu1 }
 0x1db   :  { %v298_v44 = vadd.f32 %v323_v42, %v297_v43 }
 0x1dc   :  { %v347_v45 = vpop.f32.mrf.mxu1 }
 0x1dd   :  { %301 = vst.msk [vmem:[#allocation2] sm:$0xff] %vm30_vm2, %v298_v44 }
 0x1de   :  { %376 = shalt.err (!%p373_p4)
}
 0x1df   :  { %311 = dma.vmem_to_hbm [thread:$0]  %s309_s6, 128, %s482_s5, [#allocation3]  }
 0x1e0   :  { %385 = dma.done.wait [#allocation3], 128  }
 0x1e1   :  { %386 = vsyncadd [#allocation3], 4294967168 }
 0x1e2   :  { %315 = vsyncpa [#allocation3], 1 }

</bundles_post_ra>
